<compile_context>
chip_gen: v7x
topology: tpu7x:2x2x1
jax: 0.10.0
libtpu: 0.0.40
codegen_flags: <defaults>
</compile_context>

<pallas_src>
import functools

import jax
import jax.numpy as jnp
from jax.experimental import pallas as pl
from jax.experimental.pallas import tpu as pltpu


def _round_up(x, m):
    return (x + m - 1) // m * m


def centroids_triplet_kernel(logits_ref, labels_ref, anchor_ref, pos_ref,
                             neg_ref, lab_anchor_ref, ex_ref, out_ref,
                             *, n_valid):
    i = pl.program_id(0)

    # ---------------- cross entropy partial for this row tile ----------------
    logits = logits_ref[...].astype(jnp.float32)            # (tile_n, C)
    labels = labels_ref[...]                                 # (tile_n, 1) i32
    tile_n, n_cls = logits.shape

    row_max = jnp.max(logits, axis=1, keepdims=True)
    shifted = logits - row_max
    lse = jnp.log(jnp.sum(jnp.exp(shifted), axis=1, keepdims=True))   # (tile_n,1)
    cls_iota = jax.lax.broadcasted_iota(jnp.int32, (tile_n, n_cls), 1)
    onehot = (cls_iota == labels).astype(jnp.float32)
    label_logit = jnp.sum(shifted * onehot, axis=1, keepdims=True)
    per_row_nll = lse - label_logit                                    # (tile_n,1)

    # Mask padded rows (rows >= n_valid were zero-padded in the wrapper).
    row_ids = i * tile_n + jax.lax.broadcasted_iota(jnp.int32, (tile_n, 1), 0)
    valid = (row_ids < n_valid).astype(jnp.float32)
    ce_partial = jnp.sum(per_row_nll * valid, axis=0, keepdims=True) * (1.0 / n_valid)

    # Lane/sublane-dense packed output block: sublane 0 lanes {0,1,2} carry
    # {ce_partial, center, triplet}; everything else is zero.
    sub = jax.lax.broadcasted_iota(jnp.int32, (1, 8, 128), 1)
    lane = jax.lax.broadcasted_iota(jnp.int32, (1, 8, 128), 2)
    out_ref[...] = jnp.where((sub == 0) & (lane == 0), ce_partial, 0.0)

    # ---------------- centroid + triplet hinge (grid step 0 only) ----------------
    @pl.when(i == 0)
    def _():
        anchor = anchor_ref[...].astype(jnp.float32)         # (B, D)
        pos = pos_ref[...].astype(jnp.float32)
        neg = neg_ref[...].astype(jnp.float32)
        ex = ex_ref[...].astype(jnp.float32)                 # (K, D)
        lab_a = lab_anchor_ref[...]                          # (B, 1) i32
        b, d = anchor.shape
        k = ex.shape[0]

        # MXU pairwise distances: ||a - e||^2 = ||a||^2 + ||e||^2 - 2 a.e
        a_sq = jnp.sum(anchor * anchor, axis=1, keepdims=True)          # (B, 1)
        e_sq = jax.lax.dot_general(                                      # (1, K)
            jnp.ones((1, d), jnp.float32), ex * ex,
            dimension_numbers=(((1,), (1,)), ((), ())),
            preferred_element_type=jnp.float32)
        cross = jax.lax.dot_general(                                     # (B, K)
            anchor, ex,
            dimension_numbers=(((1,), (1,)), ((), ())),
            preferred_element_type=jnp.float32)
        d2 = jnp.maximum(a_sq + e_sq - 2.0 * cross, 0.0)   # clamp cancellation
        dist_all = jnp.sqrt(d2)                                          # (B, K)

        k_iota = jax.lax.broadcasted_iota(jnp.int32, (b, k), 1)
        lab_mask = (k_iota == lab_a).astype(jnp.float32)
        dist_ref = jnp.sum(dist_all * lab_mask, axis=1, keepdims=True)   # (B, 1)
        dist_closest = jnp.min(dist_all, axis=1, keepdims=True)          # (B, 1)
        center = jnp.sum(jnp.maximum(dist_ref - dist_closest, 0.0),
                         axis=0, keepdims=True)                          # (1, 1)

        dp = anchor - pos
        dn = anchor - neg
        tp = jnp.sqrt(jnp.sum(dp * dp, axis=1, keepdims=True))           # (B, 1)
        tn = jnp.sqrt(jnp.sum(dn * dn, axis=1, keepdims=True))           # (B, 1)
        trip = jnp.sum(jnp.maximum(tp - tn, 0.0), axis=0, keepdims=True) # (1, 1)

        out_ref[...] = (out_ref[...]
                        + jnp.where((sub == 0) & (lane == 1), center, 0.0)
                        + jnp.where((sub == 0) & (lane == 2), trip, 0.0))


def centroids_triplet_loss(anchor, positive, negative, outputs,
                           labels_anchor, labels_neg, exemplars,
                           alpha_factor=0.0, beta_factor=0.0):
    """Returns (loss_total, loss_triplet, loss_softmax, loss_center) matching
    the PyTorch module's shapes: (1,), (1,), scalar, (1,)."""
    labels = jnp.concatenate(
        [labels_anchor, labels_anchor, labels_neg], axis=0).astype(jnp.int32)
    n = labels.shape[0]                      # 3*B
    b, d = anchor.shape
    k = exemplars.shape[0]
    c = outputs.shape[1]

    # Row-tile the cross entropy; pad rows to a multiple of the tile.
    # TILE_N kept modest so double-buffered blocks fit v7x's 64 MiB VMEM too.
    tile_n = min(256, _round_up(n, 8))
    n_pad = _round_up(n, tile_n)
    g = n_pad // tile_n
    logits = outputs
    if n_pad != n:
        logits = jnp.pad(logits, ((0, n_pad - n), (0, 0)))
        labels = jnp.pad(labels, ((0, n_pad - n),))
    labels_2d = labels.reshape(n_pad, 1)
    lab_anchor_2d = labels_anchor.astype(jnp.int32).reshape(b, 1)

    kernel = functools.partial(centroids_triplet_kernel, n_valid=n)

    flops = 2 * b * d * k + 8 * n_pad * c + 10 * b * d + 6 * b * k
    transcendentals = n_pad * c + n_pad + b * k + 2 * b
    bytes_accessed = (logits.size * logits.dtype.itemsize
                      + labels_2d.size * 4
                      + (anchor.size + positive.size + negative.size)
                      * anchor.dtype.itemsize
                      + exemplars.size * exemplars.dtype.itemsize
                      + b * 4 + g * 8 * 128 * 4)

    packed = pl.pallas_call(
        kernel,
        out_shape=jax.ShapeDtypeStruct((g, 8, 128), jnp.float32),
        grid_spec=pltpu.PrefetchScalarGridSpec(
            num_scalar_prefetch=0,
            grid=(g,),
            in_specs=[
                pl.BlockSpec((tile_n, c), lambda i: (i, 0)),   # logits row tile
                pl.BlockSpec((tile_n, 1), lambda i: (i, 0)),   # labels row tile
                pl.BlockSpec((b, d), lambda i: (0, 0)),        # anchor (resident)
                pl.BlockSpec((b, d), lambda i: (0, 0)),        # positive
                pl.BlockSpec((b, d), lambda i: (0, 0)),        # negative
                pl.BlockSpec((b, 1), lambda i: (0, 0)),        # labels_anchor
                pl.BlockSpec((k, d), lambda i: (0, 0)),        # exemplars
            ],
            out_specs=pl.BlockSpec((1, 8, 128), lambda i: (i, 0, 0)),
        ),
        compiler_params=pltpu.CompilerParams(
            dimension_semantics=("parallel",),
            vmem_limit_bytes=64 * 1024 * 1024),
        cost_estimate=pl.CostEstimate(
            flops=int(flops),
            transcendentals=int(transcendentals),
            bytes_accessed=int(bytes_accessed)),
    )(logits, labels_2d, anchor, positive, negative, lab_anchor_2d, exemplars)

    # Tiny (G, 8, 128) reduction of the packed partials in plain XLA.
    loss_softmax = jnp.sum(packed[:, 0, 0])            # scalar (CrossEntropyLoss)
    loss_center = jnp.sum(packed[:, 0, 1]).reshape(1)  # (1,), like torch.zeros(1)
    loss_triplet = jnp.sum(packed[:, 0, 2]).reshape(1) # (1,)
    loss_total = loss_softmax + alpha_factor * loss_center + beta_factor * loss_triplet
    return loss_total, loss_triplet, loss_softmax, loss_center


def _reference(anchor, positive, negative, outputs, labels_anchor, labels_neg,
               exemplars, alpha_factor, beta_factor):
    labels = jnp.concatenate([labels_anchor, labels_anchor, labels_neg], axis=0)
    logp = jax.nn.log_softmax(outputs, axis=1)
    loss_softmax = -jnp.mean(logp[jnp.arange(labels.shape[0]), labels])
    dist_all = jnp.linalg.norm(anchor[:, None, :] - exemplars[None, :, :], axis=2)
    dist_ref = dist_all[jnp.arange(anchor.shape[0]), labels_anchor]
    dist_closest = jnp.min(dist_all, axis=1)
    loss_center = jnp.sum(jnp.maximum(dist_ref - dist_closest, 0.0))
    tp = jnp.linalg.norm(anchor - positive, axis=1)
    tn = jnp.linalg.norm(anchor - negative, axis=1)
    loss_triplet = jnp.sum(jnp.maximum(tp - tn, 0.0))
    loss_total = loss_softmax + alpha_factor * loss_center + beta_factor * loss_triplet
    return loss_total, loss_triplet, loss_softmax, loss_center


if __name__ == "__main__":
    # Small deterministic shapes consistent with the module's forward.
    B = 8            # batch size (anchor/positive/negative)
    D = 32           # embedding dim
    NUM_CLASSES = 16 # exemplar count / logits width
    ALPHA, BETA = 0.3, 0.7

    key = jax.random.PRNGKey(0)
    k1, k2, k3, k4, k5, k6, k7 = jax.random.split(key, 7)
    anchor = jax.random.normal(k1, (B, D), dtype=jnp.float32)
    positive = jax.random.normal(k2, (B, D), dtype=jnp.float32)
    negative = jax.random.normal(k3, (B, D), dtype=jnp.float32)
    outputs = jax.random.normal(k4, (3 * B, NUM_CLASSES), dtype=jnp.float32)
    labels_anchor = jax.random.randint(k5, (B,), 0, NUM_CLASSES, dtype=jnp.int32)
    labels_neg = jax.random.randint(k6, (B,), 0, NUM_CLASSES, dtype=jnp.int32)
    exemplars = jax.random.normal(k7, (NUM_CLASSES, D), dtype=jnp.float32)

    result = centroids_triplet_loss(anchor, positive, negative, outputs,
                                    labels_anchor, labels_neg, exemplars,
                                    alpha_factor=ALPHA, beta_factor=BETA)
    result = jax.block_until_ready(result)

    ref = _reference(anchor, positive, negative, outputs, labels_anchor,
                     labels_neg, exemplars, ALPHA, BETA)
    for got, want in zip(result, ref):
        assert jnp.allclose(jnp.ravel(got), jnp.ravel(want), rtol=1e-4, atol=1e-4), \
            (got, want)

    # TODO(synk): `.cuda()` in the reference is device placement only; no kernel op.
    print("KERNEL_OK")
</pallas_src>

<mosaic_0001>
module attributes {stable_mosaic.version = 11 : i64} {
  func.func @centroids_triplet_kernel(%arg0: i32, %arg1: memref<24x16xf32, #tpu.memory_space<vmem>>, %arg2: memref<24x1xi32, #tpu.memory_space<vmem>>, %arg3: memref<8x32xf32, #tpu.memory_space<vmem>>, %arg4: memref<8x32xf32, #tpu.memory_space<vmem>>, %arg5: memref<8x32xf32, #tpu.memory_space<vmem>>, %arg6: memref<8x1xi32, #tpu.memory_space<vmem>>, %arg7: memref<16x32xf32, #tpu.memory_space<vmem>>, %arg8: memref<1x8x128xf32, #tpu.memory_space<vmem>>) attributes {dimension_semantics = [#tpu.dimension_semantics<parallel>], iteration_bounds = array<i64: 1>, scalar_prefetch = 0 : i64, scratch_operands = 0 : i64, tpu.core_type = #tpu.core_type<tc>, window_params = [{transform_indices = @transform_0, window_bounds = array<i64: 24, 16>}, {transform_indices = @transform_1, window_bounds = array<i64: 24, 1>}, {pipeline_mode = #tpu.pipeline_mode<synchronous>, transform_indices = @transform_2, window_bounds = array<i64: 8, 32>}, {pipeline_mode = #tpu.pipeline_mode<synchronous>, transform_indices = @transform_3, window_bounds = array<i64: 8, 32>}, {pipeline_mode = #tpu.pipeline_mode<synchronous>, transform_indices = @transform_4, window_bounds = array<i64: 8, 32>}, {pipeline_mode = #tpu.pipeline_mode<synchronous>, transform_indices = @transform_5, window_bounds = array<i64: 8, 1>}, {pipeline_mode = #tpu.pipeline_mode<synchronous>, transform_indices = @transform_6, window_bounds = array<i64: 16, 32>}, {transform_indices = @transform_7, window_bounds = array<i64: 1, 8, 128>}]} {
    %c0 = arith.constant 0 : index
    %c0_0 = arith.constant 0 : index
    %0 = vector.load %arg1[%c0, %c0_0] : memref<24x16xf32, #tpu.memory_space<vmem>>, vector<24x16xf32>
    %c0_1 = arith.constant 0 : index
    %c0_2 = arith.constant 0 : index
    %1 = vector.load %arg2[%c0_1, %c0_2] : memref<24x1xi32, #tpu.memory_space<vmem>>, vector<24x1xi32>
    %cst = arith.constant dense<0xFF800000> : vector<24xf32>
    %2 = vector.multi_reduction <maximumf>, %0, %cst [1] : vector<24x16xf32> to vector<24xf32>
    %3 = vector.shape_cast %2 : vector<24xf32> to vector<24x1xf32>
    %4 = vector.broadcast %3 : vector<24x1xf32> to vector<24x16xf32>
    %5 = arith.subf %0, %4 : vector<24x16xf32>
    %6 = math.exp %5 : vector<24x16xf32>
    %cst_3 = arith.constant dense<0.000000e+00> : vector<24xf32>
    %7 = vector.multi_reduction <add>, %6, %cst_3 [1] : vector<24x16xf32> to vector<24xf32>
    %8 = vector.shape_cast %7 : vector<24xf32> to vector<24x1xf32>
    %9 = math.log %8 : vector<24x1xf32>
    %10 = tpu.iota {dimensions = array<i32: 1>} : vector<24x16xi32>
    %11 = vector.broadcast %1 : vector<24x1xi32> to vector<24x16xi32>
    %12 = arith.cmpi eq, %10, %11 : vector<24x16xi32>
    %13 = arith.extui %12 : vector<24x16xi1> to vector<24x16xi32>
    %14 = arith.sitofp %13 : vector<24x16xi32> to vector<24x16xf32>
    %15 = arith.mulf %5, %14 : vector<24x16xf32>
    %cst_4 = arith.constant dense<0.000000e+00> : vector<24xf32>
    %16 = vector.multi_reduction <add>, %15, %cst_4 [1] : vector<24x16xf32> to vector<24xf32>
    %17 = vector.shape_cast %16 : vector<24xf32> to vector<24x1xf32>
    %18 = arith.subf %9, %17 : vector<24x1xf32>
    %c24_i32 = arith.constant 24 : i32
    %19 = arith.muli %arg0, %c24_i32 : i32
    %20 = tpu.iota {dimensions = array<i32: 0>} : vector<24x1xi32>
    %21 = vector.broadcast %19 : i32 to vector<24x1xi32>
    %22 = arith.addi %21, %20 : vector<24x1xi32>
    %c24_i32_5 = arith.constant 24 : i32
    %23 = vector.broadcast %c24_i32_5 : i32 to vector<24x1xi32>
    %24 = arith.cmpi slt, %22, %23 : vector<24x1xi32>
    %25 = arith.extui %24 : vector<24x1xi1> to vector<24x1xi32>
    %26 = arith.sitofp %25 : vector<24x1xi32> to vector<24x1xf32>
    %27 = arith.mulf %18, %26 : vector<24x1xf32>
    %cst_6 = arith.constant dense<0.000000e+00> : vector<1xf32>
    %28 = vector.multi_reduction <add>, %27, %cst_6 [0] : vector<24x1xf32> to vector<1xf32>
    %29 = vector.shape_cast %28 : vector<1xf32> to vector<1x1xf32>
    %cst_7 = arith.constant 0.0416666679 : f32
    %30 = vector.broadcast %cst_7 : f32 to vector<1x1xf32>
    %31 = arith.mulf %29, %30 : vector<1x1xf32>
    %32 = tpu.iota {dimensions = array<i32: 1>} : vector<1x8x128xi32>
    %33 = tpu.iota {dimensions = array<i32: 2>} : vector<1x8x128xi32>
    %c0_i32 = arith.constant 0 : i32
    %34 = vector.broadcast %c0_i32 : i32 to vector<1x8x128xi32>
    %35 = arith.cmpi eq, %32, %34 : vector<1x8x128xi32>
    %c0_i32_8 = arith.constant 0 : i32
    %36 = vector.broadcast %c0_i32_8 : i32 to vector<1x8x128xi32>
    %37 = arith.cmpi eq, %33, %36 : vector<1x8x128xi32>
    %38 = arith.andi %35, %37 : vector<1x8x128xi1>
    %cst_9 = arith.constant 0.000000e+00 : f32
    %39 = vector.shape_cast %31 : vector<1x1xf32> to vector<1x1x1xf32>
    %40 = vector.broadcast %39 : vector<1x1x1xf32> to vector<1x8x128xf32>
    %41 = vector.broadcast %cst_9 : f32 to vector<1x8x128xf32>
    %42 = arith.select %38, %40, %41 : vector<1x8x128xi1>, vector<1x8x128xf32>
    %c0_10 = arith.constant 0 : index
    %c0_11 = arith.constant 0 : index
    %c0_12 = arith.constant 0 : index
    %43 = vector.load %arg8[%c0_10, %c0_11, %c0_12] : memref<1x8x128xf32, #tpu.memory_space<vmem>>, vector<1x8x128xf32>
    tpu.vector_store %arg8[%c0_10, %c0_11, %c0_12], %42 {strides = array<i32>} : memref<1x8x128xf32, #tpu.memory_space<vmem>>, vector<1x8x128xf32>,
    %c0_i32_13 = arith.constant 0 : i32
    %44 = arith.cmpi eq, %arg0, %c0_i32_13 : i32
    %45 = arith.extui %44 : i1 to i32
    %c0_i32_14 = arith.constant 0 : i32
    %46 = arith.cmpi ne, %45, %c0_i32_14 : i32
    scf.if %46 {
      %c0_15 = arith.constant 0 : index
      %c0_16 = arith.constant 0 : index
      %47 = vector.load %arg3[%c0_15, %c0_16] : memref<8x32xf32, #tpu.memory_space<vmem>>, vector<8x32xf32>
      %c0_17 = arith.constant 0 : index
      %c0_18 = arith.constant 0 : index
      %48 = vector.load %arg4[%c0_17, %c0_18] : memref<8x32xf32, #tpu.memory_space<vmem>>, vector<8x32xf32>
      %c0_19 = arith.constant 0 : index
      %c0_20 = arith.constant 0 : index
      %49 = vector.load %arg5[%c0_19, %c0_20] : memref<8x32xf32, #tpu.memory_space<vmem>>, vector<8x32xf32>
      %c0_21 = arith.constant 0 : index
      %c0_22 = arith.constant 0 : index
      %50 = vector.load %arg7[%c0_21, %c0_22] : memref<16x32xf32, #tpu.memory_space<vmem>>, vector<16x32xf32>
      %c0_23 = arith.constant 0 : index
      %c0_24 = arith.constant 0 : index
      %51 = vector.load %arg6[%c0_23, %c0_24] : memref<8x1xi32, #tpu.memory_space<vmem>>, vector<8x1xi32>
      %52 = arith.mulf %47, %47 : vector<8x32xf32>
      %cst_25 = arith.constant dense<0.000000e+00> : vector<8xf32>
      %53 = vector.multi_reduction <add>, %52, %cst_25 [1] : vector<8x32xf32> to vector<8xf32>
      %54 = vector.shape_cast %53 : vector<8xf32> to vector<8x1xf32>
      %cst_26 = arith.constant 1.000000e+00 : f32
      %55 = vector.broadcast %cst_26 : f32 to vector<1x32xf32>
      %56 = arith.mulf %50, %50 : vector<16x32xf32>
      %cst_27 = arith.constant dense<0.000000e+00> : vector<1x16xf32>
      %57 = tpu.matmul %55, %56, %cst_27 {dimension_numbers = #tpu.dot_dimension_numbers<[1], [1], [0], [0], [0, 0, 1, 0], [], []>} : vector<1x32xf32>, vector<16x32xf32>, vector<1x16xf32> -> vector<1x16xf32>
      %cst_28 = arith.constant dense<0.000000e+00> : vector<8x16xf32>
      %58 = tpu.matmul %47, %50, %cst_28 {dimension_numbers = #tpu.dot_dimension_numbers<[1], [1], [0], [0], [0, 0, 1, 0], [], []>} : vector<8x32xf32>, vector<16x32xf32>, vector<8x16xf32> -> vector<8x16xf32>
      %59 = vector.broadcast %54 : vector<8x1xf32> to vector<8x16xf32>
      %60 = vector.broadcast %57 : vector<1x16xf32> to vector<8x16xf32>
      %61 = arith.addf %59, %60 : vector<8x16xf32>
      %cst_29 = arith.constant 2.000000e+00 : f32
      %62 = vector.broadcast %cst_29 : f32 to vector<8x16xf32>
      %63 = arith.mulf %62, %58 : vector<8x16xf32>
      %64 = arith.subf %61, %63 : vector<8x16xf32>
      %cst_30 = arith.constant 0.000000e+00 : f32
      %65 = vector.broadcast %cst_30 : f32 to vector<8x16xf32>
      %66 = arith.maximumf %64, %65 : vector<8x16xf32>
      %67 = math.sqrt %66 : vector<8x16xf32>
      %68 = tpu.iota {dimensions = array<i32: 1>} : vector<8x16xi32>
      %69 = vector.broadcast %51 : vector<8x1xi32> to vector<8x16xi32>
      %70 = arith.cmpi eq, %68, %69 : vector<8x16xi32>
      %71 = arith.extui %70 : vector<8x16xi1> to vector<8x16xi32>
      %72 = arith.sitofp %71 : vector<8x16xi32> to vector<8x16xf32>
      %73 = arith.mulf %67, %72 : vector<8x16xf32>
      %cst_31 = arith.constant dense<0.000000e+00> : vector<8xf32>
      %74 = vector.multi_reduction <add>, %73, %cst_31 [1] : vector<8x16xf32> to vector<8xf32>
      %75 = vector.shape_cast %74 : vector<8xf32> to vector<8x1xf32>
      %cst_32 = arith.constant dense<0x7F800000> : vector<8xf32>
      %76 = vector.multi_reduction <minimumf>, %67, %cst_32 [1] : vector<8x16xf32> to vector<8xf32>
      %77 = vector.shape_cast %76 : vector<8xf32> to vector<8x1xf32>
      %78 = arith.subf %75, %77 : vector<8x1xf32>
      %cst_33 = arith.constant 0.000000e+00 : f32
      %79 = vector.broadcast %cst_33 : f32 to vector<8x1xf32>
      %80 = arith.maximumf %78, %79 : vector<8x1xf32>
      %cst_34 = arith.constant dense<0.000000e+00> : vector<1xf32>
      %81 = vector.multi_reduction <add>, %80, %cst_34 [0] : vector<8x1xf32> to vector<1xf32>
      %82 = vector.shape_cast %81 : vector<1xf32> to vector<1x1xf32>
      %83 = arith.subf %47, %48 : vector<8x32xf32>
      %84 = arith.subf %47, %49 : vector<8x32xf32>
      %85 = arith.mulf %83, %83 : vector<8x32xf32>
      %cst_35 = arith.constant dense<0.000000e+00> : vector<8xf32>
      %86 = vector.multi_reduction <add>, %85, %cst_35 [1] : vector<8x32xf32> to vector<8xf32>
      %87 = vector.shape_cast %86 : vector<8xf32> to vector<8x1xf32>
      %88 = math.sqrt %87 : vector<8x1xf32>
      %89 = arith.mulf %84, %84 : vector<8x32xf32>
      %cst_36 = arith.constant dense<0.000000e+00> : vector<8xf32>
      %90 = vector.multi_reduction <add>, %89, %cst_36 [1] : vector<8x32xf32> to vector<8xf32>
      %91 = vector.shape_cast %90 : vector<8xf32> to vector<8x1xf32>
      %92 = math.sqrt %91 : vector<8x1xf32>
      %93 = arith.subf %88, %92 : vector<8x1xf32>
      %cst_37 = arith.constant 0.000000e+00 : f32
      %94 = vector.broadcast %cst_37 : f32 to vector<8x1xf32>
      %95 = arith.maximumf %93, %94 : vector<8x1xf32>
      %cst_38 = arith.constant dense<0.000000e+00> : vector<1xf32>
      %96 = vector.multi_reduction <add>, %95, %cst_38 [0] : vector<8x1xf32> to vector<1xf32>
      %97 = vector.shape_cast %96 : vector<1xf32> to vector<1x1xf32>
      %c0_39 = arith.constant 0 : index
      %c0_40 = arith.constant 0 : index
      %c0_41 = arith.constant 0 : index
      %98 = vector.load %arg8[%c0_39, %c0_40, %c0_41] : memref<1x8x128xf32, #tpu.memory_space<vmem>>, vector<1x8x128xf32>
      %c0_i32_42 = arith.constant 0 : i32
      %99 = vector.broadcast %c0_i32_42 : i32 to vector<1x8x128xi32>
      %100 = arith.cmpi eq, %32, %99 : vector<1x8x128xi32>
      %c1_i32 = arith.constant 1 : i32
      %101 = vector.broadcast %c1_i32 : i32 to vector<1x8x128xi32>
      %102 = arith.cmpi eq, %33, %101 : vector<1x8x128xi32>
      %103 = arith.andi %100, %102 : vector<1x8x128xi1>
      %cst_43 = arith.constant 0.000000e+00 : f32
      %104 = vector.shape_cast %82 : vector<1x1xf32> to vector<1x1x1xf32>
      %105 = vector.broadcast %104 : vector<1x1x1xf32> to vector<1x8x128xf32>
      %106 = vector.broadcast %cst_43 : f32 to vector<1x8x128xf32>
      %107 = arith.select %103, %105, %106 : vector<1x8x128xi1>, vector<1x8x128xf32>
      %108 = arith.addf %98, %107 : vector<1x8x128xf32>
      %c0_i32_44 = arith.constant 0 : i32
      %109 = vector.broadcast %c0_i32_44 : i32 to vector<1x8x128xi32>
      %110 = arith.cmpi eq, %32, %109 : vector<1x8x128xi32>
      %c2_i32 = arith.constant 2 : i32
      %111 = vector.broadcast %c2_i32 : i32 to vector<1x8x128xi32>
      %112 = arith.cmpi eq, %33, %111 : vector<1x8x128xi32>
      %113 = arith.andi %110, %112 : vector<1x8x128xi1>
      %cst_45 = arith.constant 0.000000e+00 : f32
      %114 = vector.shape_cast %97 : vector<1x1xf32> to vector<1x1x1xf32>
      %115 = vector.broadcast %114 : vector<1x1x1xf32> to vector<1x8x128xf32>
      %116 = vector.broadcast %cst_45 : f32 to vector<1x8x128xf32>
      %117 = arith.select %113, %115, %116 : vector<1x8x128xi1>, vector<1x8x128xf32>
      %118 = arith.addf %108, %117 : vector<1x8x128xf32>
      %c0_46 = arith.constant 0 : index
      %c0_47 = arith.constant 0 : index
      %c0_48 = arith.constant 0 : index
      %119 = vector.load %arg8[%c0_46, %c0_47, %c0_48] : memref<1x8x128xf32, #tpu.memory_space<vmem>>, vector<1x8x128xf32>
      tpu.vector_store %arg8[%c0_46, %c0_47, %c0_48], %118 {strides = array<i32>} : memref<1x8x128xf32, #tpu.memory_space<vmem>>, vector<1x8x128xf32>,
    } else {
    }
    return
  }
  func.func @transform_0(%arg0: i32) -> (i32, i32) {
    %c0_i32 = arith.constant 0 : i32
    %c0_i32_0 = arith.constant 0 : i32
    return %arg0, %c0_i32 : i32, i32
  }
  func.func @transform_1(%arg0: i32) -> (i32, i32) {
    %c0_i32 = arith.constant 0 : i32
    %c0_i32_0 = arith.constant 0 : i32
    return %arg0, %c0_i32 : i32, i32
  }
  func.func @transform_2(%arg0: i32) -> (i32, i32) {
    %c0_i32 = arith.constant 0 : i32
    %c0_i32_0 = arith.constant 0 : i32
    %c0_i32_1 = arith.constant 0 : i32
    return %c0_i32, %c0_i32_0 : i32, i32
  }
  func.func @transform_3(%arg0: i32) -> (i32, i32) {
    %c0_i32 = arith.constant 0 : i32
    %c0_i32_0 = arith.constant 0 : i32
    %c0_i32_1 = arith.constant 0 : i32
    return %c0_i32, %c0_i32_0 : i32, i32
  }
  func.func @transform_4(%arg0: i32) -> (i32, i32) {
    %c0_i32 = arith.constant 0 : i32
    %c0_i32_0 = arith.constant 0 : i32
    %c0_i32_1 = arith.constant 0 : i32
    return %c0_i32, %c0_i32_0 : i32, i32
  }
  func.func @transform_5(%arg0: i32) -> (i32, i32) {
    %c0_i32 = arith.constant 0 : i32
    %c0_i32_0 = arith.constant 0 : i32
    %c0_i32_1 = arith.constant 0 : i32
    return %c0_i32, %c0_i32_0 : i32, i32
  }
  func.func @transform_6(%arg0: i32) -> (i32, i32) {
    %c0_i32 = arith.constant 0 : i32
    %c0_i32_0 = arith.constant 0 : i32
    %c0_i32_1 = arith.constant 0 : i32
    return %c0_i32, %c0_i32_0 : i32, i32
  }
  func.func @transform_7(%arg0: i32) -> (i32, i32, i32) {
    %c0_i32 = arith.constant 0 : i32
    %c0_i32_0 = arith.constant 0 : i32
    %c0_i32_1 = arith.constant 0 : i32
    return %arg0, %c0_i32, %c0_i32_0 : i32, i32, i32
  }
}

</mosaic_0001>

<bundles_post_ra>
// kernel: tpu_custom_call.1
= control target key start
LH: loop header
LB: loop body
LE: loop exit
PB: predicated region body
PF: predicated region fallthrough
CT: control target
= control target key end

     0   :  { %12 = vsyncpa [#allocation3], 0  ;;  %s966_s0 = inlined_call_operand.hbm [shape: f32[24,16], index: 0, kind: input, shape index: {}]   ;;  %s967_s1 = inlined_call_operand.hbm [shape: s32[24,1], index: 1, kind: input, shape index: {}]   ;;  %s968_s2 = inlined_call_operand.hbm [shape: f32[8,32], index: 2, kind: input, shape index: {}]   ;;  %s969_s3 = inlined_call_operand.hbm [shape: f32[8,32], index: 3, kind: input, shape index: {}]   ;;  %s970_s4 = inlined_call_operand.hbm [shape: f32[8,32], index: 4, kind: input, shape index: {}]   ;;  %s971_s5 = inlined_call_operand.hbm [shape: s32[8,1], index: 5, kind: input, shape index: {}]   ;;  %s972_s6 = inlined_call_operand.hbm [shape: f32[16,32], index: 6, kind: input, shape index: {}]   ;;  %s973_s7 = inlined_call_operand.hbm [shape: f32[1,8,128], index: 7, kind: output, shape index: {}]  }
   0x1   :  { %13 = vsyncpa [#allocation6], 0 }
   0x2   :  { %14 = vsyncpa [#allocation9], 0 }
   0x3   :  { %15 = vsyncpa [#allocation12], 0 }
   0x4   :  { %16 = vsyncpa [#allocation4], 0  ;;  %s754_s24 = smov [#allocation5]   ;;  %s755_s26 = smov [#allocation8]  }
   0x5   :  { %s34_s25 = sshll.u32 %s754_s24, 4  ;;  %s57_s27 = sshll.u32 %s755_s26, 4  ;;  %s35_s25 = int_to_ptr.vmem [resolvable:$true] %s34_s25  ;;  %s58_s27 = int_to_ptr.vmem [resolvable:$true] %s57_s27 }
   0x6   :  { %s568_s30 = scalar_lea.hbm %s967_s1, 384 }
   0x7   :  { %p569_p0 = scmp.ne.s32.totalorder %s967_s1, %s568_s30  ;;  %p572_p1 = scmp.lt.u32.totalorder %s568_s30, %s967_s1 }
   0x9   :  { %p574_p2 = pnand %p572_p1, %p569_p0 }
   0xb   :  { %577 = shalt.err (!%p574_p2)
}
   0xc   :  { %s578_s12 = scalar_lea.vmem %s35_s25, 384  ;;  %p583_p4 = scmp.lt.s32.totalorder %s35_s25, %s35_s25 }
   0xd   :  { %p579_p3 = scmp.ne.s32.totalorder %s35_s25, %s578_s12  ;;  %p584_p5 = scmp.lt.s32.totalorder %s578_s12, %s578_s12 }
   0xf   :  { %p585_p6 = por %p584_p5, %p583_p4 }
  0x11   :  { %p586_p7 = pnand %p585_p6, %p579_p3 }
  0x13   :  { %589 = shalt.err (!%p586_p7)
}
  0x14   :  { %s756_s13 = smov 128   ;;  %s757_s14 = smov 8  }
  0x15   :  { %40 = dma.hbm_to_vmem [thread:$0]  %s967_s1, 384, %s35_s25, [#allocation6], %s756_s13, %s756_s13, %s757_s14  }
  0x16   :  { %s590_s19 = scalar_lea.hbm %s969_s3, 128 }
  0x17   :  { %p591_p8 = scmp.ne.s32.totalorder %s969_s3, %s590_s19  ;;  %p594_p9 = scmp.lt.u32.totalorder %s590_s19, %s969_s3 }
  0x19   :  { %p596_p10 = pnand %p594_p9, %p591_p8 }
  0x1b   :  { %599 = shalt.err (!%p596_p10)
}
  0x1c   :  { %s600_s24 = scalar_lea.vmem %s58_s27, 128  ;;  %p605_p12 = scmp.lt.s32.totalorder %s58_s27, %s58_s27 }
  0x1d   :  { %p601_p11 = scmp.ne.s32.totalorder %s58_s27, %s600_s24  ;;  %p606_p13 = scmp.lt.s32.totalorder %s600_s24, %s600_s24 }
  0x1f   :  { %p607_p0 = por %p606_p13, %p605_p12 }
  0x21   :  { %p608_p1 = pnand %p607_p0, %p601_p11 }
  0x23   :  { %611 = shalt.err (!%p608_p1)
}
  0x24   :  { %60 = dma.hbm_to_vmem [thread:$0]  %s969_s3, 128, %s58_s27, [#allocation9]  }
  0x25   :  { %s758_s26 = smov [#allocation11]   ;;  %s759_s29 = smov [#allocation2]  }
  0x26   :  { %s77_s28 = sshll.u32 %s758_s26, 4  ;;  %s22_s30 = sshll.u32 %s759_s29, 4  ;;  %s78_s28 = int_to_ptr.vmem [resolvable:$true] %s77_s28  ;;  %s836_s30 = int_to_ptr.vmem [resolvable:$true] %s22_s30 }
  0x27   :  { %s612_s10 = scalar_lea.hbm %s971_s5, 128 }
  0x28   :  { %p613_p2 = scmp.ne.s32.totalorder %s971_s5, %s612_s10  ;;  %p616_p3 = scmp.lt.u32.totalorder %s612_s10, %s971_s5 }
  0x2a   :  { %p618_p4 = pnand %p616_p3, %p613_p2 }
  0x2c   :  { %621 = shalt.err (!%p618_p4)
}
  0x2d   :  { %s622_s3 = scalar_lea.vmem %s78_s28, 128  ;;  %p627_p6 = scmp.lt.s32.totalorder %s78_s28, %s78_s28 }
  0x2e   :  { %p623_p5 = scmp.ne.s32.totalorder %s78_s28, %s622_s3  ;;  %p628_p7 = scmp.lt.s32.totalorder %s622_s3, %s622_s3 }
  0x30   :  { %p629_p8 = por %p628_p7, %p627_p6 }
  0x32   :  { %p630_p9 = pnand %p629_p8, %p623_p5 }
  0x34   :  { %633 = shalt.err (!%p630_p9)
}
  0x35   :  { %80 = dma.hbm_to_vmem [thread:$0]  %s971_s5, 128, %s78_s28, [#allocation12]  }
  0x36   :  { %s634_s20 = scalar_lea.hbm %s966_s0, 384 }
  0x37   :  { %p635_p10 = scmp.ne.s32.totalorder %s966_s0, %s634_s20  ;;  %p638_p11 = scmp.lt.u32.totalorder %s634_s20, %s966_s0 }
  0x39   :  { %p640_p12 = pnand %p638_p11, %p635_p10 }
  0x3b   :  { %643 = shalt.err (!%p640_p12)
}
  0x3c   :  { %s644_s1 = scalar_lea.vmem %s836_s30, 384  ;;  %p649_p0 = scmp.lt.s32.totalorder %s836_s30, %s836_s30 }
  0x3d   :  { %p645_p13 = scmp.ne.s32.totalorder %s836_s30, %s644_s1  ;;  %p650_p1 = scmp.lt.s32.totalorder %s644_s1, %s644_s1 }
  0x3f   :  { %p651_p2 = por %p650_p1, %p649_p0 }
  0x41   :  { %p652_p3 = pnand %p651_p2, %p645_p13 }
  0x43   :  { %655 = shalt.err (!%p652_p3)
}
  0x44   :  { %28 = dma.hbm_to_vmem [thread:$0]  %s966_s0, 384, %s836_s30, [#allocation3], %s756_s13, %s756_s13, %s757_s14  }
  0x45   :  { %s760_s26 = smov [#allocation7]   ;;  %s761_s29 = smov [#allocation10]  }
  0x46   :  { %s47_s28 = sshll.u32 %s760_s26, 4  ;;  %s67_s8 = sshll.u32 %s761_s29, 4  ;;  %s48_s28 = int_to_ptr.vmem [resolvable:$true] %s47_s28  ;;  %s68_s8 = int_to_ptr.vmem [resolvable:$true] %s67_s8 }
  0x47   :  { %s656_s11 = scalar_lea.hbm %s968_s2, 128 }
  0x48   :  { %p657_p4 = scmp.ne.s32.totalorder %s968_s2, %s656_s11  ;;  %p660_p5 = scmp.lt.u32.totalorder %s656_s11, %s968_s2 }
  0x4a   :  { %p662_p6 = pnand %p660_p5, %p657_p4 }
  0x4c   :  { %665 = shalt.err (!%p662_p6)
}
  0x4d   :  { %s666_s0 = scalar_lea.vmem %s48_s28, 128  ;;  %p671_p8 = scmp.lt.s32.totalorder %s48_s28, %s48_s28 }
  0x4e   :  { %p667_p7 = scmp.ne.s32.totalorder %s48_s28, %s666_s0  ;;  %p672_p9 = scmp.lt.s32.totalorder %s666_s0, %s666_s0 }
  0x50   :  { %p673_p10 = por %p672_p9, %p671_p8 }
  0x52   :  { %p674_p11 = pnand %p673_p10, %p667_p7 }
  0x54   :  { %677 = shalt.err (!%p674_p11)
}
  0x55   :  { %50 = dma.hbm_to_vmem [thread:$0]  %s968_s2, 128, %s48_s28, [#allocation6]  }
  0x56   :  { %s678_s19 = scalar_lea.hbm %s970_s4, 128 }
  0x57   :  { %p679_p12 = scmp.ne.s32.totalorder %s970_s4, %s678_s19  ;;  %p682_p13 = scmp.lt.u32.totalorder %s678_s19, %s970_s4 }
  0x59   :  { %p684_p0 = pnand %p682_p13, %p679_p12 }
  0x5b   :  { %687 = shalt.err (!%p684_p0)
}
  0x5c   :  { %s688_s24 = scalar_lea.vmem %s68_s8, 128  ;;  %p693_p2 = scmp.lt.s32.totalorder %s68_s8, %s68_s8 }
  0x5d   :  { %p689_p1 = scmp.ne.s32.totalorder %s68_s8, %s688_s24  ;;  %p694_p3 = scmp.lt.s32.totalorder %s688_s24, %s688_s24 }
  0x5f   :  { %p695_p4 = por %p694_p3, %p693_p2 }
  0x61   :  { %p696_p5 = pnand %p695_p4, %p689_p1 }
  0x63   :  { %699 = shalt.err (!%p696_p5)
}
  0x64   :  { %70 = dma.hbm_to_vmem [thread:$0]  %s970_s4, 128, %s68_s8, [#allocation9]  }
  0x65   :  { %s762_s5 = smov [#allocation13]   ;;  %s700_s29 = scalar_lea.hbm %s972_s6, 256 }
  0x66   :  { %s86_s25 = sshll.u32 %s762_s5, 4  ;;  %p701_p6 = scmp.ne.s32.totalorder %s972_s6, %s700_s29  ;;  %s87_s25 = int_to_ptr.vmem [resolvable:$true] %s86_s25 }
  0x67   :  { %p704_p7 = scmp.lt.u32.totalorder %s700_s29, %s972_s6 }
  0x69   :  { %p706_p8 = pnand %p704_p7, %p701_p6 }
  0x6b   :  { %709 = shalt.err (!%p706_p8)
}
  0x6c   :  { %s710_s15 = scalar_lea.vmem %s87_s25, 256  ;;  %p715_p10 = scmp.lt.s32.totalorder %s87_s25, %s87_s25 }
  0x6d   :  { %p711_p9 = scmp.ne.s32.totalorder %s87_s25, %s710_s15  ;;  %p716_p11 = scmp.lt.s32.totalorder %s710_s15, %s710_s15 }
  0x6f   :  { %p717_p12 = por %p716_p11, %p715_p10 }
  0x71   :  { %p718_p13 = pnand %p717_p12, %p711_p9 }
  0x73   :  { %721 = shalt.err (!%p718_p13)
}
  0x74   :  { %92 = dma.hbm_to_vmem [thread:$0]  %s972_s6, 256, %s87_s25, [#allocation12], %s756_s13, %s756_s13, %s757_s14  }
  0x75   :  { %744 = dma.done.wait [#allocation3], 384  }
  0x76   :  { %745 = vsyncadd [#allocation3], 4294966912 }
  0x77   :  { %746 = dma.done.wait [#allocation6], 512  }
  0x78   :  { %747 = vsyncadd [#allocation6], 4294966784 }
  0x79   :  { %748 = dma.done.wait [#allocation9], 256  }
  0x7a   :  { %749 = vsyncadd [#allocation9], 4294967040 }
  0x7b   :  { %750 = dma.done.wait [#allocation12], 384  }
  0x7c   :  { %751 = vsyncadd [#allocation12], 4294966912  ;;  %v763_v0 = vmov 0.0|0.0   ;;  %vm764_vm0 = vmmov 0   ;;  %v765_v1 = vmov 0.0   ;;  %vm235_vm1 = vcmask 261120  }
  0x7d   :  { %525 = vmatprep.subr.bf16.mxu0 %v763_v0  ;;  %529 = vmatprep.subr.bf16.mxu1 %v763_v0  ;;  %v766_v2 = vmov 0   ;;  %vm913_vm2 = vmpackc.low %vm235_vm1, %vm235_vm1  ;;  %vm120_vm3 = vcmask 130048   ;;  %v231_v4 = vld [vmem:[#allocation13] sm:$0xff]  ;;  %v232_v5 = vld [vmem:[#allocation13 + $0x8] sm:$0xff]  ;;  %v767_v19 = vmov 1.0   ;;  %v154_v41 = vlaneseq  ;;  %s768_s6 = smov [#allocation14]  }
  0x7e   :  { %515 = vmatprep.mubr.msk.f32.mxu0 %vm764_vm0, %v765_v1  ;;  %522 = vmatprep.mubr.msk.f32.mxu1 %vm764_vm0, %v765_v1  ;;  %v228_v6 = vld [vmem:[#allocation7] sm:$0xff]  ;;  %v239_v7 = vmul.f32 %v231_v4, %v231_v4  ;;  %v240_v8 = vmul.f32 %v232_v5, %v232_v5  ;;  %v530_v9 = vpack.c.bf16 %v232_v5, %v231_v4  ;;  %v114_v10 = vld [vmem:[#allocation2] sm:$0xff]  ;;  %v115_v12 = vld [vmem:[#allocation2 + $0x8] sm:$0xff]  ;;  %s483_s13 = sshll.u32 %s768_s6, 4  ;;  %s484_s13 = int_to_ptr.vmem [resolvable:$true] %s483_s13 }
  0x7f   :  { %549 = vset.pattern.permute.xlu1 %v766_v2  ;;  %548 = vset.pattern.permute.xlu0 %v766_v2  ;;  %v116_v11 = vld [vmem:[#allocation2 + $0x10] sm:$0xff]  ;;  %v234_v13 = vmul.f32 %v228_v6, %v228_v6  ;;  %v121_v14 = vsel %vm120_vm3, %v114_v10, -inf  ;;  %v124_v17 = vsel %vm120_vm3, %v115_v12, -inf  ;;  %v118_v20 = vld [vmem:[#allocation5 + $0x8] sm:$0xff]  ;;  %v117_v21 = vld [vmem:[#allocation5] sm:$0xff]  ;;  %v929_v43 = vand.u32 127, %v154_v41  ;;  %p727_p1 = scmp.lt.s32.totalorder %s484_s13, %s484_s13 }
  0x80   :  { %v127_v15 = vsel %vm120_vm3, %v116_v11, -inf  ;;  %v526_v16 = vpack.c.bf16 %v240_v8, %v239_v7  ;;  %532 = vmatpush3.bf16.xpose.msk.msra.mxu1 %vm913_vm2, %v530_v9  ;;  %122 = vmax.xlane.f32.xlu0 %v121_v14  ;;  %v119_v22 = vld [vmem:[#allocation5 + $0x10] sm:$0xff]  ;;  %v229_v24 = vld [vmem:[#allocation8] sm:$0xff]  ;;  %v230_v27 = vld [vmem:[#allocation10] sm:$0xff]  ;;  %v943_v62 = vshrl.u32 %v154_v41, 7  ;;  %s722_s14 = scalar_lea.vmem %s484_s13, 128 }
  0x81   :  { %128 = vmax.xlane.f32.xlu1 %v127_v15  ;;  %v236_v18 = vsel %vm235_vm1, %v234_v13, 0.0  ;;  %v233_v23 = vld [vmem:[#allocation11] sm:$0xff]  ;;  %v435_v25 = vsub.f32 %v228_v6, %v229_v24  ;;  %v436_v29 = vsub.f32 %v228_v6, %v230_v27  ;;  %vm220_vm15 = vcmp.eq.s32.totalorder %v929_v43, 0  ;;  %p723_p0 = scmp.ne.s32.totalorder %s484_s13, %s722_s14  ;;  %p728_p2 = scmp.lt.s32.totalorder %s722_s14, %s722_s14 }
  0x82   :  { %528 = vmatpush3.bf16.xpose.msk.msra.mxu0 %vm913_vm2, %v526_v16  ;;  %v401_v63 = vsub.s32 0, %v943_v62  ;;  %vm219_vm14 = vcmp.eq.s32.totalorder %v943_v62, 0  ;;  %vm468_vm0 = vcmp.eq.s32.totalorder %v929_v43, 1 }
  0x83   :  { %v437_v26 = vmul.f32 %v435_v25, %v435_v25  ;;  %v448_v30 = vmul.f32 %v436_v29, %v436_v29  ;;  %vm221_vm2 = vmand %vm219_vm14, %vm220_vm15  ;;  %p729_p3 = por %p728_p2, %p727_p1 }
  0x84   :  { %125 = vmax.xlane.f32.xlu0 %v124_v17 }
  0x85   :  { %237 = vadd.xlane.f32.xlu1 %v236_v18  ;;  %v438_v28 = vsel %vm235_vm1, %v437_v26, 0.0  ;;  %v449_v31 = vsel %vm235_vm1, %v448_v30, 0.0  ;;  %p730_p4 = pnand %p729_p3, %p723_p0 }
  0x87   :  { %523 = vmatmul.mubr.msk.f32.vlgmr.msra.gmra.mrb[0].mxu1 %vm235_vm1, %v228_v6 }
  0x89   :  { %516 = vmatmul.mubr.msk.f32.vlgmr.msra.gmra.mrb[0].mxu0 %vm235_vm1, %v767_v19  ;;  %vm472_vm1 = vcmp.eq.s32.totalorder %v929_v43, 2 }
  0x96   :  { %160 = vperm.xlu1 %549, %v118_v20  }
  0x9a   :  { %157 = vperm.xlu0 %548, %v117_v21   ;;  %163 = vperm.xlu1 %549, %v119_v22  }
  0x9e   :  { %415 = vperm.xlu1 %549, %v233_v23  }
 0x10d   :  { %v123_v32 = vpop.xlane.xlu0 %122 }
 0x10e   :  { %v130_v33 = vsub.f32 %v114_v10, %v123_v32  ;;  %v129_v34 = vpop.xlane.xlu1 %128 }
 0x10f   :  { %v132_v35 = vsub.f32 %v116_v11, %v129_v34 }
 0x110   :  { %v133_v36 = vmul.f32 1.442695, %v130_v33 }
 0x111   :  { %v137_v37 = vmul.f32 1.442695, %v132_v35  ;;  %v126_v38 = vpop.xlane.xlu0 %125 }
 0x112   :  { %550 = vpow2.f32 %v133_v36  ;;  %v131_v39 = vsub.f32 %v115_v12, %v126_v38  ;;  %v238_v40 = vpop.xlane.xlu1 %237 }
 0x113   :  { %552 = vpow2.f32 %v137_v37 }
 0x114   :  { %v135_v42 = vmul.f32 1.442695, %v131_v39 }
 0x116   :  { %554 = vpow2.f32 %v135_v42  ;;  %v161_v44 = vpop.permute.xlu1 %160 }
 0x117   :  { %vm166_vm4 = vcmp.eq.s32.totalorder %v929_v43, %v161_v44 }
 0x118   :  { %v496_v46 = vsel %vm166_vm4, 1.0, %v765_v1  ;;  %vm473_vm4 = vmand %vm219_vm14, %vm472_vm1 }
 0x119   :  { %v158_v49 = vpop.permute.xlu0 %157  ;;  %v175_v51 = vmul.f32 %v496_v46, %v131_v39 }
 0x11a   :  { %vm165_vm5 = vcmp.eq.s32.totalorder %v929_v43, %v158_v49  ;;  %v164_v54 = vpop.permute.xlu1 %163 }
 0x11b   :  { %v180_v55 = vsel %vm120_vm3, %v175_v51, 0.0  ;;  %v495_v56 = vsel %vm165_vm5, 1.0, %v765_v1  ;;  %vm167_vm6 = vcmp.eq.s32.totalorder %v929_v43, %v164_v54 }
 0x11c   :  { %v551_v45 = vpop.eup %550  ;;  %v174_v57 = vmul.f32 %v495_v56, %v130_v33  ;;  %v497_v58 = vsel %vm167_vm6, 1.0, %v765_v1 }
 0x11d   :  { %v553_v47 = vpop.eup %552  ;;  %v139_v48 = vsel %vm120_vm3, %v551_v45, 0.0  ;;  %v176_v60 = vmul.f32 %v497_v58, %v132_v35 }
 0x11e   :  { %140 = vadd.xlane.f32.xlu1 %v139_v48  ;;  %v145_v50 = vsel %vm120_vm3, %v553_v47, 0.0  ;;  %v177_v59 = vsel %vm120_vm3, %v174_v57, 0.0  ;;  %v416_v10 = vpop.permute.xlu1 %415 }
 0x11f   :  { %v183_v61 = vsel %vm120_vm3, %v176_v60, 0.0  ;;  %vm417_vm7 = vcmp.eq.s32.totalorder %v929_v43, %v416_v10 }
 0x120   :  { %v555_v52 = vpop.eup %554  ;;  %v504_v15 = vsel %vm417_vm7, 1.0, %v765_v1 }
 0x121   :  { %v142_v53 = vsel %vm120_vm3, %v555_v52, 0.0 }
 0x122   :  { %146 = vadd.xlane.f32.xlu1 %v145_v50  ;;  %143 = vadd.xlane.f32.xlu0 %v142_v53 }
 0x126   :  { %439 = vadd.xlane.f32.xlu1 %v438_v28  ;;  %181 = vadd.xlane.f32.xlu0 %v180_v55 }
 0x12a   :  { %450 = vadd.xlane.f32.xlu1 %v449_v31 }
 0x12e   :  { %178 = vadd.xlane.f32.xlu1 %v177_v59 }
 0x132   :  { %184 = vadd.xlane.f32.xlu1 %v183_v61 }
 0x15a   :  { %v395_v0 = vpop.f32.mrb[0].mxu1 }
 0x15b   :  { %v524_v2 = vpop.f32.mrb[1].mxu1  ;;  %v404_v6 = vmul.f32 2.0, %v395_v0 }
 0x15c   :  { %v316_v3 = vpop.f32.mrb[0].mxu0 }
 0x15d   :  { %v402_v4 = vrot.slane %v316_v3, %v401_v63  ;;  %v517_v5 = vpop.f32.mrb[1].mxu0 }
 0x15f   :  { %v403_v7 = vadd.f32 %v402_v4, %v238_v40 }
 0x161   :  { %v405_v8 = vsub.f32 %v403_v7, %v404_v6 }
 0x163   :  { %v406_v9 = vmax.f32 %v405_v8, 0.0 }
 0x165   :  { %556 = vrsqrt.f32 %v406_v9  ;;  %vm409_vm8 = vcmp.eq.f32.partialorder %v406_v9, inf  ;;  %v412_v13 = vand.u32 2147483648, %v406_v9  ;;  %vm411_vm9 = vcmp.eq.f32.partialorder %v406_v9, 0.0 }
 0x16f   :  { %v557_v11 = vpop.eup %556 }
 0x170   :  { %v408_v12 = vmul.f32 %v557_v11, %v406_v9 }
 0x172   :  { %v410_v14 = vsel %vm409_vm8, %v406_v9, %v408_v12 }
 0x173   :  { %v413_v16 = vsel %vm411_vm9, %v412_v13, %v410_v14 }
 0x174   :  { %v424_v17 = vsel %vm120_vm3, %v413_v16, inf  ;;  %v420_v18 = vmul.f32 %v504_v15, %v413_v16 }
 0x175   :  { %425 = vmin.xlane.f32.xlu1 %v424_v17 }
 0x176   :  { %v421_v19 = vsel %vm120_vm3, %v420_v18, 0.0  ;;  %vm469_vm3 = vmand %vm219_vm14, %vm468_vm0 }
 0x177   :  { %422 = vadd.xlane.f32.xlu0 %v421_v19 }
 0x1ab   :  { %v141_v20 = vpop.xlane.xlu1 %140 }
 0x1ac   :  { %558 = vlog2.f32 %v141_v20 }
 0x1af   :  { %v147_v21 = vpop.xlane.xlu1 %146  ;;  %v144_v22 = vpop.xlane.xlu0 %143 }
 0x1b0   :  { %560 = vlog2.f32 %v144_v22 }
 0x1b1   :  { %562 = vlog2.f32 %v147_v21 }
 0x1b3   :  { %v440_v23 = vpop.xlane.xlu1 %439  ;;  %v182_v32 = vpop.xlane.xlu0 %181 }
 0x1b4   :  { %564 = vrsqrt.f32 %v440_v23  ;;  %vm443_vm10 = vcmp.eq.f32.partialorder %v440_v23, inf  ;;  %vm445_vm12 = vcmp.eq.f32.partialorder %v440_v23, 0.0  ;;  %v446_v39 = vand.u32 2147483648, %v440_v23 }
 0x1b6   :  { %v559_v25 = vpop.eup %558 }
 0x1b7   :  { %v451_v24 = vpop.xlane.xlu1 %450  ;;  %v149_v29 = vmul.f32 0.6931472, %v559_v25 }
 0x1b8   :  { %566 = vrsqrt.f32 %v451_v24  ;;  %vm454_vm11 = vcmp.eq.f32.partialorder %v451_v24, inf  ;;  %vm456_vm13 = vcmp.eq.f32.partialorder %v451_v24, 0.0  ;;  %v457_v40 = vand.u32 2147483648, %v451_v24 }
 0x1ba   :  { %v561_v1 = vpop.eup %560 }
 0x1bb   :  { %v563_v26 = vpop.eup %562  ;;  %v179_v27 = vpop.xlane.xlu1 %178  ;;  %v151_v30 = vmul.f32 0.6931472, %v561_v1 }
 0x1bc   :  { %v153_v33 = vmul.f32 0.6931472, %v563_v26  ;;  %v186_v36 = vsub.f32 %v149_v29, %v179_v27 }
 0x1bd   :  { %v187_v37 = vsub.f32 %v151_v30, %v182_v32 }
 0x1be   :  { %v565_v28 = vpop.eup %564 }
 0x1bf   :  { %v442_v34 = vmul.f32 %v565_v28, %v440_v23  ;;  %v185_v38 = vpop.xlane.xlu1 %184  ;;  %v210_v44 = vadd.f32 %v187_v37, %v186_v36 }
 0x1c0   :  { %v188_v45 = vsub.f32 %v153_v33, %v185_v38 }
 0x1c1   :  { %v444_v41 = vsel %vm443_vm10, %v440_v23, %v442_v34 }
 0x1c2   :  { %v567_v31 = vpop.eup %566  ;;  %v447_v46 = vsel %vm445_vm12, %v446_v39, %v444_v41  ;;  %v211_v48 = vadd.f32 %v210_v44, %v188_v45 }
 0x1c3   :  { %v453_v35 = vmul.f32 %v567_v31, %v451_v24 }
 0x1c4   :  { %v212_v50 = vrot.slane %v211_v48, 4 }
 0x1c5   :  { %v455_v42 = vsel %vm454_vm11, %v451_v24, %v453_v35 }
 0x1c6   :  { %v458_v47 = vsel %vm456_vm13, %v457_v40, %v455_v42  ;;  %v213_v52 = vadd.f32 %v212_v50, %v211_v48 }
 0x1c7   :  { %v459_v49 = vsub.f32 %v447_v46, %v458_v47 }
 0x1c8   :  { %v214_v54 = vrot.slane %v213_v52, 2 }
 0x1c9   :  { %v460_v51 = vmax.f32 %v459_v49, 0.0 }
 0x1ca   :  { %v215_v58 = vadd.f32 %v214_v54, %v213_v52 }
 0x1cb   :  { %v461_v53 = vrot.slane %v460_v51, 4 }
 0x1cc   :  { %v216_v63 = vrot.slane %v215_v58, 1 }
 0x1cd   :  { %v462_v55 = vadd.f32 %v461_v53, %v460_v51 }
 0x1ce   :  { %v217_v4 = vadd.f32 %v216_v63, %v215_v58 }
 0x1cf   :  { %v463_v61 = vrot.slane %v462_v55, 2 }
 0x1d0   :  { %v218_v9 = vmul.f32 0.041666668, %v217_v4 }
 0x1d1   :  { %v464_v3 = vadd.f32 %v463_v61, %v462_v55 }
 0x1d2   :  { %v222_v12 = vsel %vm221_vm2, %v218_v9, 0.0 }
 0x1d3   :  { %v465_v7 = vrot.slane %v464_v3, 1 }
 0x1d5   :  { %v466_v11 = vadd.f32 %v465_v7, %v464_v3 }
 0x1d7   :  { %v474_v14 = vsel %vm473_vm4, %v466_v11, 0.0 }
 0x202   :  { %v426_v56 = vpop.xlane.xlu1 %425 }
 0x204   :  { %v423_v57 = vpop.xlane.xlu0 %422 }
 0x205   :  { %v427_v59 = vsub.f32 %v423_v57, %v426_v56 }
 0x207   :  { %v428_v60 = vmax.f32 %v427_v59, 0.0 }
 0x209   :  { %v429_v0 = vrot.slane %v428_v60, 4 }
 0x20b   :  { %v430_v2 = vadd.f32 %v429_v0, %v428_v60 }
 0x20d   :  { %v431_v5 = vrot.slane %v430_v2, 2 }
 0x20f   :  { %v432_v6 = vadd.f32 %v431_v5, %v430_v2 }
 0x211   :  { %v433_v8 = vrot.slane %v432_v6, 1 }
 0x213   :  { %v434_v10 = vadd.f32 %v433_v8, %v432_v6 }
 0x215   :  { %v470_v13 = vsel %vm469_vm3, %v434_v10, 0.0 }
 0x216   :  { %v471_v62 = vadd.f32 %v470_v13, %v222_v12 }
 0x218   :  { %v475_v15 = vadd.f32 %v474_v14, %v471_v62 }
 0x21a   :  { %476 = vst [vmem:[#allocation14] sm:$0xff] %v475_v15 }
 0x21b   :  { %733 = shalt.err (!%p730_p4)
}
 0x21c   :  { %s734_s0 = scalar_lea.hbm %s973_s7, 128 }
 0x21d   :  { %p735_p5 = scmp.ne.s32.totalorder %s973_s7, %s734_s0  ;;  %p738_p6 = scmp.lt.u32.totalorder %s734_s0, %s973_s7 }
 0x21f   :  { %p740_p7 = pnand %p738_p6, %p735_p5 }
 0x221   :  { %743 = shalt.err (!%p740_p7)
}
 0x222   :  { %486 = dma.vmem_to_hbm [thread:$0]  %s484_s13, 128, %s973_s7, [#allocation4]  }
 0x223   :  { %752 = dma.done.wait [#allocation4], 128  }
 0x224   :  { %753 = vsyncadd [#allocation4], 4294967168 }
 0x225   :  { %490 = vsyncpa [#allocation3], 1 }
 0x226   :  { %491 = vsyncpa [#allocation6], 1 }
 0x227   :  { %492 = vsyncpa [#allocation9], 1 }
 0x228   :  { %493 = vsyncpa [#allocation12], 1 }
 0x229   :  { %494 = vsyncpa [#allocation4], 1 }

</bundles_post_ra>
